<compile_context>
chip_gen: v6e
topology: v6e:2x2x1
jax: 0.10.0
libtpu: 0.0.40
codegen_flags: <defaults>
</compile_context>

<pallas_src>
import jax
import jax.numpy as jnp
from jax import lax
from jax.experimental import pallas as pl
from jax.experimental.pallas import tpu as pltpu


# ---------------------------------------------------------------------------
# Fused kernel: input projection GEMM + scanpath gather + GRU recurrence.
#   pos_ref   : (B, K) int32  — scalar-prefetch (SMEM) gaze token positions
#   maxlen_ref: (1,)   int32  — scalar-prefetch (SMEM) max(sp_len) loop bound
#   pooler_ref: (B*S, H)      — flattened sp_pooler_output
#   h0_ref    : (B, H)        — sp_pooler_output[:, 0, :]
#   len_ref   : (B, 1) int32  — sp_len (packed-sequence mask)
#   wih/whh   : (H, 3H), bih/bhh : (1, 3H)  — gate order [r | z | n] (PyTorch GRU)
#   o_ref     : (B, H)        — last_hidden[0, :]
#   p_scratch : (B*S, 3H) f32 — projected pooler (gi for every possible token)
#   gi_scratch: (B, 3H)  f32  — per-step gathered input gates
# ---------------------------------------------------------------------------
def _sp_encoder_kernel(pos_ref, maxlen_ref,
                       pooler_ref, h0_ref, len_ref,
                       wih_ref, whh_ref, bih_ref, bhh_ref,
                       o_ref, p_scratch, gi_scratch):
    BS, H = pooler_ref.shape
    B = h0_ref.shape[0]
    S = BS // B

    # One big MXU GEMM: input projection for every token, hoisted out of the recurrence.
    # (gather commutes with the linear map, so gathering rows of P == projecting x_sp).
    p_scratch[...] = (
        jnp.dot(pooler_ref[...].astype(jnp.float32), wih_ref[...],
                preferred_element_type=jnp.float32)
        + bih_ref[...]
    )

    w_hh = whh_ref[...]
    b_hh = bhh_ref[...]
    lengths = len_ref[...]                       # (B, 1) int32
    h0 = h0_ref[...].astype(jnp.float32)         # (B, H)

    def step(t, h):
        # Gather the pre-projected input gates for timestep t (B dynamic row loads).
        for b in range(B):
            idx = b * S + pos_ref[b, t]
            gi_scratch[pl.ds(b, 1), :] = p_scratch[pl.ds(idx, 1), :]
        gi = gi_scratch[...]                     # (B, 3H) == x_t @ W_ih + b_ih

        # Only the hidden-to-hidden matmul remains on the sequential critical path.
        gh = jnp.dot(h, w_hh, preferred_element_type=jnp.float32) + b_hh

        r = jax.nn.sigmoid(gi[:, :H] + gh[:, :H])
        z = jax.nn.sigmoid(gi[:, H:2 * H] + gh[:, H:2 * H])
        n = jnp.tanh(gi[:, 2 * H:] + r * gh[:, 2 * H:])
        h_new = (1.0 - z) * n + z * h

        # Packed-sequence semantics: batch b freezes once t >= sp_len[b].
        return jnp.where(t < lengths, h_new, h)

    # Clip the recurrence to the longest real scanpath; padded steps are skipped.
    h_last = lax.fori_loop(0, maxlen_ref[0], step, h0)
    o_ref[...] = h_last.astype(o_ref.dtype)


def sp_encoder_forward(params, sp_pooler_output, gaze_token_pos, sp_len):
    # nn.Dropout(0.1) is identity in eval mode.
    B, S, H = sp_pooler_output.shape
    K = gaze_token_pos.shape[1]

    pos = gaze_token_pos.astype(jnp.int32)                     # (B, K)
    lengths = sp_len.astype(jnp.int32)                         # (B,)
    max_len = jnp.max(lengths).reshape(1).astype(jnp.int32)    # (1,)
    pooler2d = sp_pooler_output.reshape(B * S, H)              # contiguous, no copy
    h0 = sp_pooler_output[:, 0, :]                             # (B, H)

    kernel = pl.pallas_call(
        _sp_encoder_kernel,
        out_shape=jax.ShapeDtypeStruct((B, H), jnp.float32),
        grid_spec=pltpu.PrefetchScalarGridSpec(
            num_scalar_prefetch=2,
            grid=(1,),
            in_specs=[
                pl.BlockSpec((B * S, H), lambda i, p, m: (0, 0)),     # pooler (flat)
                pl.BlockSpec((B, H), lambda i, p, m: (0, 0)),         # h0
                pl.BlockSpec((B, 1), lambda i, p, m: (0, 0)),         # lengths
                pl.BlockSpec((H, 3 * H), lambda i, p, m: (0, 0)),     # w_ih
                pl.BlockSpec((H, 3 * H), lambda i, p, m: (0, 0)),     # w_hh
                pl.BlockSpec((1, 3 * H), lambda i, p, m: (0, 0)),     # b_ih
                pl.BlockSpec((1, 3 * H), lambda i, p, m: (0, 0)),     # b_hh
            ],
            out_specs=pl.BlockSpec((B, H), lambda i, p, m: (0, 0)),
            scratch_shapes=[
                pltpu.VMEM((B * S, 3 * H), jnp.float32),   # projected pooler
                pltpu.VMEM((B, 3 * H), jnp.float32),       # per-step gathered gi
            ],
        ),
        compiler_params=pltpu.CompilerParams(
            dimension_semantics=("arbitrary",),
            vmem_limit_bytes=64 * 1024 * 1024,
        ),
    )
    return kernel(pos, max_len, pooler2d, h0, lengths.reshape(B, 1),
                  params["w_ih"], params["w_hh"], params["b_ih"], params["b_hh"])


# ---------------------------------------------------------------------------
# Glue: parameters, SP_Gen stub, pure-JAX reference
# ---------------------------------------------------------------------------
def init_gru_params(key, hidden):
    # torch.nn.GRU default U(-1/sqrt(H), 1/sqrt(H)); stored pre-transposed (H, 3H),
    # gate order [r | z | n].
    k = 1.0 / jnp.sqrt(hidden)
    k1, k2, k3, k4 = jax.random.split(key, 4)
    return {
        "w_ih": jax.random.uniform(k1, (hidden, 3 * hidden), jnp.float32, -k, k),
        "w_hh": jax.random.uniform(k2, (hidden, 3 * hidden), jnp.float32, -k, k),
        "b_ih": jax.random.uniform(k3, (1, 3 * hidden), jnp.float32, -k, k),
        "b_hh": jax.random.uniform(k4, (1, 3 * hidden), jnp.float32, -k, k),
    }


def sp_gen_stub(key, batch, max_sp_len, seq_len):
    # TODO(synk): SP_Gen (frozen pretrained RoBERTa + 8-layer bi-LSTM Eyettention,
    # torch.multinomial scanpath sampling, and the data-dependent Python-loop
    # word->token position conversion / pad_sequence) has no clean Pallas equivalent;
    # emit deterministic synthetic (gaze_token_pos, sp_len) of the same shapes instead.
    k1, k2 = jax.random.split(key)
    sp_len = jax.random.randint(k1, (batch,), 2, max_sp_len + 1)
    pos = jax.random.randint(k2, (batch, max_sp_len), 0, seq_len)
    pad_mask = jnp.arange(max_sp_len)[None, :] >= sp_len[:, None]
    pos = jnp.where(pad_mask, seq_len - 1, pos)   # mirrors pad_sequence padding_value
    return pos.astype(jnp.int32), sp_len.astype(jnp.float32)


def reference_forward(params, sp_pooler_output, gaze_token_pos, sp_len):
    # Faithful to the PyTorch module: one-hot einsum gather + per-step GRU with masking.
    B, S, H = sp_pooler_output.shape
    K = gaze_token_pos.shape[1]
    token_ids = jnp.arange(S, dtype=jnp.int32)[None, None, :]
    one_hot = (token_ids == gaze_token_pos.astype(jnp.int32)[:, :, None]).astype(jnp.float32)
    x_sp = jnp.einsum('bij,bki->bkj', sp_pooler_output, one_hot)
    h0 = sp_pooler_output[:, 0, :]
    w_ih, w_hh, b_ih, b_hh = (params["w_ih"], params["w_hh"],
                              params["b_ih"], params["b_hh"])
    lengths = sp_len.astype(jnp.int32)

    def step(h, inp):
        x_t, t = inp
        gi = x_t @ w_ih + b_ih
        gh = h @ w_hh + b_hh
        r = jax.nn.sigmoid(gi[:, :H] + gh[:, :H])
        z = jax.nn.sigmoid(gi[:, H:2 * H] + gh[:, H:2 * H])
        n = jnp.tanh(gi[:, 2 * H:] + r * gh[:, 2 * H:])
        h_new = (1.0 - z) * n + z * h
        return jnp.where((t < lengths)[:, None], h_new, h), None

    x_tm = jnp.transpose(x_sp, (1, 0, 2))
    h_last, _ = lax.scan(step, h0, (x_tm, jnp.arange(K)))
    return h_last


if __name__ == "__main__":
    B, S, H, K = 2, 16, 32, 8   # batch, LM seq len, hidden (config.hidden_size), max scanpath len
    key = jax.random.PRNGKey(0)
    k_pool, k_gen, k_w = jax.random.split(key, 3)

    sp_pooler_output = jax.random.normal(k_pool, (B, S, H), dtype=jnp.float32)
    gaze_token_pos, sp_len = sp_gen_stub(k_gen, B, K, S)
    params = init_gru_params(k_w, H)

    fwd = jax.jit(sp_encoder_forward)
    out = fwd(params, sp_pooler_output, gaze_token_pos, sp_len)
    out = jax.block_until_ready(out)

    ref = reference_forward(params, sp_pooler_output, gaze_token_pos, sp_len)
    assert out.shape == (B, H), out.shape
    err = float(jnp.max(jnp.abs(out - ref)))
    assert jnp.allclose(out, ref, atol=1e-4, rtol=1e-4), err
    print("KERNEL_OK")
</pallas_src>

<mosaic_0001>
module attributes {stable_mosaic.version = 11 : i64} {
  func.func @_sp_encoder_kernel(%arg0: i32, %arg1: memref<2x8xi32, #tpu.memory_space<smem>>, %arg2: memref<1xi32, #tpu.memory_space<smem>>, %arg3: memref<32x32xf32, #tpu.memory_space<vmem>>, %arg4: memref<2x32xf32, #tpu.memory_space<vmem>>, %arg5: memref<2x1xi32, #tpu.memory_space<vmem>>, %arg6: memref<32x96xf32, #tpu.memory_space<vmem>>, %arg7: memref<32x96xf32, #tpu.memory_space<vmem>>, %arg8: memref<1x96xf32, #tpu.memory_space<vmem>>, %arg9: memref<1x96xf32, #tpu.memory_space<vmem>>, %arg10: memref<2x32xf32, #tpu.memory_space<vmem>>, %arg11: memref<32x96xf32, #tpu.memory_space<vmem>>, %arg12: memref<2x96xf32, #tpu.memory_space<vmem>>) attributes {dimension_semantics = [#tpu.dimension_semantics<arbitrary>], iteration_bounds = array<i64: 1>, scalar_prefetch = 2 : i64, scratch_operands = 2 : i64, tpu.core_type = #tpu.core_type<tc>, window_params = [{pipeline_mode = #tpu.pipeline_mode<synchronous>, transform_indices = @transform_0, window_bounds = array<i64: 32, 32>}, {pipeline_mode = #tpu.pipeline_mode<synchronous>, transform_indices = @transform_1, window_bounds = array<i64: 2, 32>}, {pipeline_mode = #tpu.pipeline_mode<synchronous>, transform_indices = @transform_2, window_bounds = array<i64: 2, 1>}, {pipeline_mode = #tpu.pipeline_mode<synchronous>, transform_indices = @transform_3, window_bounds = array<i64: 32, 96>}, {pipeline_mode = #tpu.pipeline_mode<synchronous>, transform_indices = @transform_4, window_bounds = array<i64: 32, 96>}, {pipeline_mode = #tpu.pipeline_mode<synchronous>, transform_indices = @transform_5, window_bounds = array<i64: 1, 96>}, {pipeline_mode = #tpu.pipeline_mode<synchronous>, transform_indices = @transform_6, window_bounds = array<i64: 1, 96>}, {pipeline_mode = #tpu.pipeline_mode<synchronous>, transform_indices = @transform_7, window_bounds = array<i64: 2, 32>}]} {
    %c0 = arith.constant 0 : index
    %c0_0 = arith.constant 0 : index
    %0 = vector.load %arg3[%c0, %c0_0] : memref<32x32xf32, #tpu.memory_space<vmem>>, vector<32x32xf32>
    %c0_1 = arith.constant 0 : index
    %c0_2 = arith.constant 0 : index
    %1 = vector.load %arg6[%c0_1, %c0_2] : memref<32x96xf32, #tpu.memory_space<vmem>>, vector<32x96xf32>
    %cst = arith.constant dense<0.000000e+00> : vector<32x96xf32>
    %2 = tpu.matmul %0, %1, %cst {dimension_numbers = #tpu.dot_dimension_numbers<[1], [0], [0], [1], [0, 0, 1, 1], [], []>} : vector<32x32xf32>, vector<32x96xf32>, vector<32x96xf32> -> vector<32x96xf32>
    %c0_3 = arith.constant 0 : index
    %c0_4 = arith.constant 0 : index
    %3 = vector.load %arg8[%c0_3, %c0_4] : memref<1x96xf32, #tpu.memory_space<vmem>>, vector<1x96xf32>
    %4 = vector.broadcast %3 : vector<1x96xf32> to vector<32x96xf32>
    %5 = arith.addf %2, %4 : vector<32x96xf32>
    %c0_5 = arith.constant 0 : index
    %c0_6 = arith.constant 0 : index
    %6 = vector.load %arg11[%c0_5, %c0_6] : memref<32x96xf32, #tpu.memory_space<vmem>>, vector<32x96xf32>
    tpu.vector_store %arg11[%c0_5, %c0_6], %5 {strides = array<i32>} : memref<32x96xf32, #tpu.memory_space<vmem>>, vector<32x96xf32>,
    %c0_7 = arith.constant 0 : index
    %c0_8 = arith.constant 0 : index
    %7 = vector.load %arg7[%c0_7, %c0_8] : memref<32x96xf32, #tpu.memory_space<vmem>>, vector<32x96xf32>
    %c0_9 = arith.constant 0 : index
    %c0_10 = arith.constant 0 : index
    %8 = vector.load %arg9[%c0_9, %c0_10] : memref<1x96xf32, #tpu.memory_space<vmem>>, vector<1x96xf32>
    %c0_11 = arith.constant 0 : index
    %c0_12 = arith.constant 0 : index
    %9 = vector.load %arg5[%c0_11, %c0_12] : memref<2x1xi32, #tpu.memory_space<vmem>>, vector<2x1xi32>
    %c0_13 = arith.constant 0 : index
    %c0_14 = arith.constant 0 : index
    %10 = vector.load %arg4[%c0_13, %c0_14] : memref<2x32xf32, #tpu.memory_space<vmem>>, vector<2x32xf32>
    %c0_15 = arith.constant 0 : index
    %11 = memref.load %arg2[%c0_15] : memref<1xi32, #tpu.memory_space<smem>>
    %c0_i32 = arith.constant 0 : i32
    %12 = arith.subi %11, %c0_i32 : i32
    %13 = arith.addi %c0_i32, %12 : i32
    %c1_i32 = arith.constant 1 : i32
    %14 = scf.for %arg13 = %c0_i32 to %13 step %c1_i32 iter_args(%arg14 = %10) -> (vector<2x32xf32>)  : i32 {
      %c0_18 = arith.constant 0 : index
      %16 = arith.index_cast %arg13 : i32 to index
      %17 = memref.load %arg1[%c0_18, %16] : memref<2x8xi32, #tpu.memory_space<smem>>
      %c0_i32_19 = arith.constant 0 : i32
      %18 = arith.addi %c0_i32_19, %17 : i32
      %19 = arith.index_cast %18 : i32 to index
      %c0_20 = arith.constant 0 : index
      %20 = vector.load %arg11[%19, %c0_20] : memref<32x96xf32, #tpu.memory_space<vmem>>, vector<1x96xf32>
      %c0_21 = arith.constant 0 : index
      %c0_22 = arith.constant 0 : index
      %21 = vector.load %arg12[%c0_21, %c0_22] : memref<2x96xf32, #tpu.memory_space<vmem>>, vector<1x96xf32>
      tpu.vector_store %arg12[%c0_21, %c0_22], %20 {strides = array<i32>} : memref<2x96xf32, #tpu.memory_space<vmem>>, vector<1x96xf32>,
      %c1 = arith.constant 1 : index
      %22 = arith.index_cast %arg13 : i32 to index
      %23 = memref.load %arg1[%c1, %22] : memref<2x8xi32, #tpu.memory_space<smem>>
      %c16_i32 = arith.constant 16 : i32
      %24 = arith.addi %c16_i32, %23 : i32
      %25 = arith.index_cast %24 : i32 to index
      %c0_23 = arith.constant 0 : index
      %26 = vector.load %arg11[%25, %c0_23] : memref<32x96xf32, #tpu.memory_space<vmem>>, vector<1x96xf32>
      %c1_24 = arith.constant 1 : index
      %c0_25 = arith.constant 0 : index
      %27 = vector.load %arg12[%c1_24, %c0_25] : memref<2x96xf32, #tpu.memory_space<vmem>>, vector<1x96xf32>
      tpu.vector_store %arg12[%c1_24, %c0_25], %26 {strides = array<i32>} : memref<2x96xf32, #tpu.memory_space<vmem>>, vector<1x96xf32>,
      %c0_26 = arith.constant 0 : index
      %c0_27 = arith.constant 0 : index
      %28 = vector.load %arg12[%c0_26, %c0_27] : memref<2x96xf32, #tpu.memory_space<vmem>>, vector<2x96xf32>
      %cst_28 = arith.constant dense<0.000000e+00> : vector<2x96xf32>
      %29 = tpu.matmul %arg14, %7, %cst_28 {dimension_numbers = #tpu.dot_dimension_numbers<[1], [0], [0], [1], [0, 0, 1, 1], [], []>} : vector<2x32xf32>, vector<32x96xf32>, vector<2x96xf32> -> vector<2x96xf32>
      %30 = vector.broadcast %8 : vector<1x96xf32> to vector<2x96xf32>
      %31 = arith.addf %29, %30 : vector<2x96xf32>
      %32 = vector.extract_strided_slice %28 {offsets = [0, 0], sizes = [2, 32], strides = [1, 1]} : vector<2x96xf32> to vector<2x32xf32>
      %33 = vector.extract_strided_slice %31 {offsets = [0, 0], sizes = [2, 32], strides = [1, 1]} : vector<2x96xf32> to vector<2x32xf32>
      %34 = arith.addf %32, %33 : vector<2x32xf32>
      %35 = arith.negf %34 : vector<2x32xf32>
      %36 = math.exp %35 : vector<2x32xf32>
      %cst_29 = arith.constant 1.000000e+00 : f32
      %37 = vector.broadcast %cst_29 : f32 to vector<2x32xf32>
      %38 = arith.addf %37, %36 : vector<2x32xf32>
      %39 = arith.divf %37, %38 : vector<2x32xf32>
      %40 = vector.extract_strided_slice %28 {offsets = [0, 32], sizes = [2, 32], strides = [1, 1]} : vector<2x96xf32> to vector<2x32xf32>
      %41 = vector.extract_strided_slice %31 {offsets = [0, 32], sizes = [2, 32], strides = [1, 1]} : vector<2x96xf32> to vector<2x32xf32>
      %42 = arith.addf %40, %41 : vector<2x32xf32>
      %43 = arith.negf %42 : vector<2x32xf32>
      %44 = math.exp %43 : vector<2x32xf32>
      %cst_30 = arith.constant 1.000000e+00 : f32
      %45 = vector.broadcast %cst_30 : f32 to vector<2x32xf32>
      %46 = arith.addf %45, %44 : vector<2x32xf32>
      %47 = arith.divf %45, %46 : vector<2x32xf32>
      %48 = vector.extract_strided_slice %28 {offsets = [0, 64], sizes = [2, 32], strides = [1, 1]} : vector<2x96xf32> to vector<2x32xf32>
      %49 = vector.extract_strided_slice %31 {offsets = [0, 64], sizes = [2, 32], strides = [1, 1]} : vector<2x96xf32> to vector<2x32xf32>
      %50 = arith.mulf %39, %49 : vector<2x32xf32>
      %51 = arith.addf %48, %50 : vector<2x32xf32>
      %52 = math.tanh %51 : vector<2x32xf32>
      %cst_31 = arith.constant 1.000000e+00 : f32
      %53 = vector.broadcast %cst_31 : f32 to vector<2x32xf32>
      %54 = arith.subf %53, %47 : vector<2x32xf32>
      %55 = arith.mulf %54, %52 : vector<2x32xf32>
      %56 = arith.mulf %47, %arg14 : vector<2x32xf32>
      %57 = arith.addf %55, %56 : vector<2x32xf32>
      %58 = vector.broadcast %arg13 : i32 to vector<2x1xi32>
      %59 = arith.cmpi slt, %58, %9 : vector<2x1xi32>
      %60 = vector.shape_cast %59 : vector<2x1xi1> to vector<2x1xi1>
      %61 = vector.broadcast %60 : vector<2x1xi1> to vector<2x32xi1>
      %62 = arith.select %61, %57, %arg14 : vector<2x32xi1>, vector<2x32xf32>
      scf.yield %62 : vector<2x32xf32>
    }
    %c0_16 = arith.constant 0 : index
    %c0_17 = arith.constant 0 : index
    %15 = vector.load %arg10[%c0_16, %c0_17] : memref<2x32xf32, #tpu.memory_space<vmem>>, vector<2x32xf32>
    tpu.vector_store %arg10[%c0_16, %c0_17], %14 {strides = array<i32>} : memref<2x32xf32, #tpu.memory_space<vmem>>, vector<2x32xf32>,
    return
  }
  func.func @transform_0(%arg0: i32, %arg1: memref<2x8xi32, #tpu.memory_space<smem>>, %arg2: memref<1xi32, #tpu.memory_space<smem>>) -> (i32, i32) {
    %c0_i32 = arith.constant 0 : i32
    %c0_i32_0 = arith.constant 0 : i32
    %c0_i32_1 = arith.constant 0 : i32
    return %c0_i32, %c0_i32_0 : i32, i32
  }
  func.func @transform_1(%arg0: i32, %arg1: memref<2x8xi32, #tpu.memory_space<smem>>, %arg2: memref<1xi32, #tpu.memory_space<smem>>) -> (i32, i32) {
    %c0_i32 = arith.constant 0 : i32
    %c0_i32_0 = arith.constant 0 : i32
    %c0_i32_1 = arith.constant 0 : i32
    return %c0_i32, %c0_i32_0 : i32, i32
  }
  func.func @transform_2(%arg0: i32, %arg1: memref<2x8xi32, #tpu.memory_space<smem>>, %arg2: memref<1xi32, #tpu.memory_space<smem>>) -> (i32, i32) {
    %c0_i32 = arith.constant 0 : i32
    %c0_i32_0 = arith.constant 0 : i32
    %c0_i32_1 = arith.constant 0 : i32
    return %c0_i32, %c0_i32_0 : i32, i32
  }
  func.func @transform_3(%arg0: i32, %arg1: memref<2x8xi32, #tpu.memory_space<smem>>, %arg2: memref<1xi32, #tpu.memory_space<smem>>) -> (i32, i32) {
    %c0_i32 = arith.constant 0 : i32
    %c0_i32_0 = arith.constant 0 : i32
    %c0_i32_1 = arith.constant 0 : i32
    return %c0_i32, %c0_i32_0 : i32, i32
  }
  func.func @transform_4(%arg0: i32, %arg1: memref<2x8xi32, #tpu.memory_space<smem>>, %arg2: memref<1xi32, #tpu.memory_space<smem>>) -> (i32, i32) {
    %c0_i32 = arith.constant 0 : i32
    %c0_i32_0 = arith.constant 0 : i32
    %c0_i32_1 = arith.constant 0 : i32
    return %c0_i32, %c0_i32_0 : i32, i32
  }
  func.func @transform_5(%arg0: i32, %arg1: memref<2x8xi32, #tpu.memory_space<smem>>, %arg2: memref<1xi32, #tpu.memory_space<smem>>) -> (i32, i32) {
    %c0_i32 = arith.constant 0 : i32
    %c0_i32_0 = arith.constant 0 : i32
    %c0_i32_1 = arith.constant 0 : i32
    return %c0_i32, %c0_i32_0 : i32, i32
  }
  func.func @transform_6(%arg0: i32, %arg1: memref<2x8xi32, #tpu.memory_space<smem>>, %arg2: memref<1xi32, #tpu.memory_space<smem>>) -> (i32, i32) {
    %c0_i32 = arith.constant 0 : i32
    %c0_i32_0 = arith.constant 0 : i32
    %c0_i32_1 = arith.constant 0 : i32
    return %c0_i32, %c0_i32_0 : i32, i32
  }
  func.func @transform_7(%arg0: i32, %arg1: memref<2x8xi32, #tpu.memory_space<smem>>, %arg2: memref<1xi32, #tpu.memory_space<smem>>) -> (i32, i32) {
    %c0_i32 = arith.constant 0 : i32
    %c0_i32_0 = arith.constant 0 : i32
    %c0_i32_1 = arith.constant 0 : i32
    return %c0_i32, %c0_i32_0 : i32, i32
  }
}

</mosaic_0001>

<bundles_post_ra>
// kernel: sp_encoder_forward.1
= control target key start
LH: loop header
LB: loop body
LE: loop exit
PB: predicated region body
PF: predicated region fallthrough
CT: control target
= control target key end

     0   :  { %s746_s0 = inlined_call_operand.vmem [shape: s32[2,8], index: 0, kind: input, shape index: {}]   ;;  %s747_s1 = inlined_call_operand.<no memory space> [shape: s32[1], index: 1, kind: input, shape index: {}]   ;;  %s748_s2 = inlined_call_operand.hbm [shape: f32[32,32], index: 2, kind: input, shape index: {}]   ;;  %s749_s3 = inlined_call_operand.vmem [shape: f32[2,32], index: 3, kind: input, shape index: {}]   ;;  %s750_s4 = inlined_call_operand.vmem [shape: s32[2,1], index: 4, kind: input, shape index: {}]   ;;  %s751_s5 = inlined_call_operand.hbm [shape: f32[32,96], index: 5, kind: input, shape index: {}]   ;;  %s752_s6 = inlined_call_operand.hbm [shape: f32[32,96], index: 6, kind: input, shape index: {}]   ;;  %s753_s7 = inlined_call_operand.vmem [shape: f32[1,96], index: 7, kind: input, shape index: {}]   ;;  %s754_s8 = inlined_call_operand.vmem [shape: f32[1,96], index: 8, kind: input, shape index: {}]   ;;  %s755_s9 = inlined_call_operand.hbm [shape: f32[2,32], index: 9, kind: output, shape index: {}]  }
   0x1   :  { %s14_s11 = sshll.u32 %s746_s0, 4  ;;  %s15_s11 = int_to_ptr.vmem [resolvable:$true] %s14_s11 }
   0x2   :  { %s481_s12 = scalar_lea.vmem %s15_s11, 32  ;;  %p486_p1 = scmp.lt.s32.totalorder %s15_s11, %s15_s11 }
   0x3   :  { %p482_p0 = scmp.ne.s32.totalorder %s15_s11, %s481_s12  ;;  %p487_p2 = scmp.lt.s32.totalorder %s481_s12, %s481_s12 }
   0x5   :  { %p488_p3 = por %p487_p2, %p486_p1 }
   0x7   :  { %p489_p4 = pnand %p488_p3, %p482_p0 }
   0x9   :  { %492 = shalt.err (!%p489_p4)  }
   0xa   :  { %s605_s13 = smov [#allocation5]  }
   0xb   :  { %17 = dma.vmem_to_smem %s15_s11, 32, %s605_s13, [#allocation4] }
   0xc   :  { %585 = dma.done.wait [#allocation4], 32 }
   0xd   :  { %586 = vsyncadd [#allocation4], 4294967264 }
   0xe   :  { %20 = sfence }
   0xf   :  { %21 = vsyncpa [#allocation8], 0 }
  0x10   :  { %22 = vsyncpa [#allocation11], 0 }
  0x11   :  { %23 = vsyncpa [#allocation9], 0  ;;  %s606_s14 = smov [#allocation10]   ;;  %s607_s16 = smov [#allocation7]  }
  0x12   :  { %s45_s15 = sshll.u32 %s606_s14, 4  ;;  %s29_s0 = sshll.u32 %s607_s16, 4  ;;  %s46_s15 = int_to_ptr.vmem [resolvable:$true] %s45_s15  ;;  %s30_s0 = int_to_ptr.vmem [resolvable:$true] %s29_s0 }
  0x13   :  { %s501_s17 = scalar_lea.vmem %s46_s15, 512  ;;  %p506_p6 = scmp.lt.s32.totalorder %s46_s15, %s46_s15 }
  0x14   :  { %p502_p5 = scmp.ne.s32.totalorder %s46_s15, %s501_s17  ;;  %p507_p7 = scmp.lt.s32.totalorder %s501_s17, %s501_s17 }
  0x16   :  { %p508_p8 = por %p507_p7, %p506_p6 }
  0x18   :  { %p509_p9 = pnand %p508_p8, %p502_p5 }
  0x1a   :  { %512 = shalt.err (!%p509_p9)
}
  0x1b   :  { %s608_s18 = smov 128   ;;  %s609_s19 = smov 8  }
  0x1c   :  { %51 = dma.hbm_to_vmem [thread:$0]  %s751_s5, 512, %s46_s15, [#allocation11], %s608_s18, %s608_s18, %s609_s19  }
  0x1d   :  { %s521_s22 = scalar_lea.vmem %s30_s0, 512  ;;  %p526_p11 = scmp.lt.s32.totalorder %s30_s0, %s30_s0 }
  0x1e   :  { %p522_p10 = scmp.ne.s32.totalorder %s30_s0, %s521_s22  ;;  %p527_p12 = scmp.lt.s32.totalorder %s521_s22, %s521_s22 }
  0x20   :  { %p528_p13 = por %p527_p12, %p526_p11 }
  0x22   :  { %p529_p0 = pnand %p528_p13, %p522_p10 }
  0x24   :  { %532 = shalt.err (!%p529_p0)
}
  0x25   :  { %35 = dma.hbm_to_vmem [thread:$0]  %s748_s2, 512, %s30_s0, [#allocation8], %s608_s18, %s608_s18, %s609_s19  }
  0x26   :  { %s610_s25 = smov [#allocation12]  }
  0x27   :  { %s57_s26 = sshll.u32 %s610_s25, 4  ;;  %s58_s26 = int_to_ptr.vmem [resolvable:$true] %s57_s26 }
  0x28   :  { %s541_s27 = scalar_lea.vmem %s58_s26, 512  ;;  %p546_p2 = scmp.lt.s32.totalorder %s58_s26, %s58_s26 }
  0x29   :  { %p542_p1 = scmp.ne.s32.totalorder %s58_s26, %s541_s27  ;;  %p547_p3 = scmp.lt.s32.totalorder %s541_s27, %s541_s27 }
  0x2b   :  { %p548_p4 = por %p547_p3, %p546_p2 }
  0x2d   :  { %p549_p5 = pnand %p548_p4, %p542_p1 }
  0x2f   :  { %552 = shalt.err (!%p549_p5)
}
  0x30   :  { %63 = dma.hbm_to_vmem [thread:$0]  %s752_s6, 512, %s58_s26, [#allocation11], %s608_s18, %s608_s18, %s609_s19  }
  0x31   :  { %587 = dma.done.wait [#allocation8], 512  }
  0x32   :  { %588 = vsyncadd [#allocation8], 4294966784 }
  0x33   :  { %589 = dma.done.wait [#allocation11], 1024  }
  0x34   :  { %590 = vsyncadd [#allocation11], 4294966272  ;;  %v680_v0 = vld [vmem:[#allocation12] sm:$0xff]  ;;  %v682_v1 = vld [vmem:[#allocation12 + $0x8] sm:$0xff]  ;;  %vm92_vm0 = vcmask 261120   ;;  %vm190_vm1 = vcmask 785408  }
  0x35   :  { %v684_v2 = vld [vmem:[#allocation12 + $0x10] sm:$0xff]  ;;  %v686_v3 = vld [vmem:[#allocation12 + $0x18] sm:$0xff]  ;;  %v82_v9 = vld [vmem:[#allocation10 + $0x8] sm:$0xff]  ;;  %p382_p6 = scmp.le.s32.totalorder %s747_s1, 0 }
  0x36   :  { %v691_v4 = vld [vmem:[%s754_s8] ss:$0 sm:$0xff]  ;;  %v83_v8 = vld [vmem:[#allocation10 + $0x10] sm:$0xff]  ;;  %v81_v10 = vld [vmem:[#allocation10] sm:$0xff] }
  0x37   :  { %v696_v5 = vld [vmem:[%s750_s4] sm:$0x3]  ;;  %v77_v11 = vld [vmem:[#allocation7] sm:$0xff]  ;;  %v79_v12 = vld [vmem:[#allocation7 + $0x10] sm:$0xff] }
  0x38   :  { %v201_v6 = vld [vmem:[%s749_s3] sm:$0x3]   ;;  %v78_v13 = vld [vmem:[#allocation7 + $0x8] sm:$0xff]  ;;  %411 = vmatprep.mubr.msk.f32.mxu0 %vm92_vm0, %v77_v11  ;;  %414 = vmatprep.mubr.msk.f32.mxu1 %vm92_vm0, %v79_v12 }
  0x39   :  { %v84_v7 = vld [vmem:[#allocation10 + $0x18] sm:$0xff]  ;;  %v756_v24 = vmov %v201_v6 }
  0x3a   :  { %403 = vmatprep.subr.mxu0 %v84_v7  ;;  %428 = vmatprep.subr.mxu1 %v84_v7  ;;  %v80_v14 = vld [vmem:[#allocation7 + $0x18] sm:$0xff] }
  0x3b   :  { %404 = vmatpush3.msra.mxu0 %v84_v7  ;;  %432 = vmatpush3.msra.mxu1 %v84_v7  ;;  %v377_v15 = vld [vmem:[%s753_s7] ss:$0 sm:$0xff]  ;;  %s715_s7 = smov (!%p382_p6), 0  }
  0x3c   :  { %405 = vmatprep.subr.mxu0 %v83_v8  ;;  %429 = vmatprep.subr.mxu1 %v83_v8 }
  0x3d   :  { %406 = vmatpush3.msra.mxu0 %v83_v8  ;;  %433 = vmatpush3.msra.mxu1 %v83_v8 }
  0x3e   :  { %407 = vmatprep.subr.mxu0 %v82_v9  ;;  %430 = vmatprep.subr.mxu1 %v82_v9 }
  0x3f   :  { %408 = vmatpush3.msra.mxu0 %v82_v9  ;;  %434 = vmatpush3.msra.mxu1 %v82_v9 }
  0x40   :  { %409 = vmatprep.subr.mxu0 %v81_v10  ;;  %431 = vmatprep.subr.mxu1 %v81_v10 }
  0x41   :  { %410 = vmatpush3.msra.mxu0 %v81_v10  ;;  %435 = vmatpush3.msra.mxu1 %v81_v10 }
  0x42   :  { %412 = vmatmul.mubr.msk.f32.vlgmr.msra.gmra.mxu0 %vm92_vm0, %v78_v13  ;;  %415 = vmatmul.mubr.msk.f32.vlgmr.msra.gmra.mxu1 %vm92_vm0, %v80_v14 }
 0x102   :  { %v413_v16 = vpop.f32.mrf.mxu0  ;;  %v416_v17 = vpop.f32.mrf.mxu1 }
 0x103   :  { %v177_v18 = vadd.f32 %v413_v16, %v377_v15  ;;  %v187_v19 = vadd.f32 %v416_v17, %v377_v15  ;;  %372 = sbr.rel (%p382_p6) target bundleno = 952 (0x3b8), region = 63 }
 0x104   :  { %v171_v20 = vpop.f32.mrf.mxu0  ;;  %v181_v21 = vpop.f32.mrf.mxu1 }
 0x105   :  { %192 = vst.msk [vmem:[#allocation2 + $0x8] sm:$0xff] %vm190_vm1, %v177_v18  ;;  %194 = vst.msk [vmem:[#allocation2 + $0x18] sm:$0xff] %vm190_vm1, %v187_v19  ;;  %v172_v22 = vadd.f32 %v377_v15, %v171_v20  ;;  %v182_v23 = vadd.f32 %v377_v15, %v181_v21 }
 0x107   :  { %191 = vst.msk [vmem:[#allocation2] sm:$0xff] %vm190_vm1, %v172_v22  ;;  %193 = vst.msk [vmem:[#allocation2 + $0x10] sm:$0xff] %vm190_vm1, %v182_v23 }
 0x108 LB: > { %v611_v25 = vmov 0.0   ;;  %vm612_vm2 = vmmov 0   ;;  %s210_s13 = sld [smem:[#allocation5 + %s599_s7]]  ;;  %s215_s14 = sshra.s32 %s599_s7, 7  ;;  %vm213_vm3 = vcmask 778240   ;;  %v336_v36 = vstv %s599_s7  ;;  %s599_s7 = sphi %s715_s7, %s206_s7   ;;  %v595_v6 = vphi %v201_v6, %v757_v6  }
 0x109   : > { %417 = vmatprep.subr.mxu0 %v611_v25  ;;  %425 = vmatprep.mubr.msk.f32.mxu0 %vm612_vm2, %v611_v25  ;;  %s388_s15 = sshll.u32 %s215_s14, 7  ;;  %s220_s16 = sand.u32 127, %s599_s7  ;;  %vm337_vm4 = vcmp.lt.s32.totalorder %v336_v36, %v696_v5  ;;  %v614_v37 = vmov 0  }
 0x10a   : > { %418 = vmatpush3.msra.mxu0 %v686_v3  ;;  %s389_s0 = sadd.s32 128, %s388_s15  ;;  %s613_s21 = smov 64   ;;  %473 = vset.pattern.permute.xlu1 %v614_v37  ;;  %v338_v38 = vsel %vm337_vm4, 1, %v614_v37 }
 0x10b   : > { %419 = vmatprep.subr.mxu0 %v611_v25  ;;  %s221_s17 = sadd.s32 %s389_s0, %s220_s16  ;;  %474 = vset.pattern.permute.xlu0 %v614_v37  ;;  %s615_s22 = smov 32  }
 0x10c   : > { %420 = vmatpush3.msra.mxu0 %v684_v2  ;;  %s222_s18 = sld [smem:[#allocation5 + %s221_s17]]  ;;  %340 = vperm.xlu1 %473, %v338_v38   ;;  %s616_s23 = smov 96  }
 0x10d   : > { %421 = vmatprep.subr.mxu0 %v611_v25  ;;  %s206_s7 = sadd.s32 1, %s599_s7  }
 0x10e   : > { %422 = vmatpush3.msra.mxu0 %v682_v1  ;;  %s211_s19 = scalar_lea.vmem [#allocation2], %s210_s13  ;;  %p205_p7 = scmp.ge.s32.totalorder %s206_s7, %s747_s1 }
 0x10f   : > { %423 = vmatprep.subr.mxu0 %v611_v25  ;;  %v212_v26 = vld [vmem:[%s211_s19] sm:$0x1] }
 0x110   : > { %424 = vmatpush3.msra.mxu0 %v680_v0  ;;  %214 = vst.msk [vmem:[#allocation3] sm:$0x1] %vm213_vm3, %v212_v26 }
 0x111   : > { %426 = vmatmul.mubr.msk.f32.vlgmr.msra.gmra.mxu0 %vm92_vm0, %v595_v6 }
 0x112   : > { %s367_s20 = scalar_lea.vmem [#allocation2], %s222_s18 }
 0x113   : > { %v384_v27 = vld [vmem:[%s367_s20 + $0x10] sm:$0x1] }
 0x114   : > { %226 = vst.msk [vmem:[#allocation3 + $0x1] sm:$0x1] %vm213_vm3, %v384_v27 }
 0x11b   : > { %v227_v31 = vld [vmem:[#allocation3] sm:$0x3] }
 0x187   : > { %v341_v45 = vpop.permute.xlu1 %340 }
 0x188   : > { %vm342_vm5 = vcmp.eq.s32.totalorder %v341_v45, 1 }
 0x1d1   : > { %v303_v28 = vpop.f32.mrf.mxu0 }
 0x1d2   : > { %v304_v29 = vadd.f32 %v691_v4, %v303_v28 }
 0x1d3   : > { %v427_v30 = vpop.f32.mrf.mxu0 }
 0x1d4   : > { %315 = vrot.lane.b32.xlu0 %v304_v29, %s613_s21  ;;  %v307_v32 = vadd.f32 %v304_v29, %v227_v31 }
 0x1d6   : > { %v387_v33 = vmul.f32 -1.442695, %v307_v32 }
 0x1d8   : > { %475 = vpow2.f32 %v387_v33 }
 0x1e5   : > { %v476_v34 = vpop.eup %475 }
 0x1e6   : > { %v311_v35 = vadd.f32 1.0, %v476_v34 }
 0x1e8   : > { %477 = vrcp.f32 %v311_v35 }
 0x1f5   : > { %v478_v39 = vpop.eup %477 }
 0x1f6   : > { %v325_v47 = vsub.f32 1.0, %v478_v39 }
 0x246   : > { %v316_v40 = vpop.permute.xlu0 %315 }
 0x247   : > { %v318_v41 = vmul.f32 %v478_v39, %v316_v40 }
 0x249   : > { %320 = vrot.lane.b32.xlu0 %v318_v41, %s613_s21 }
 0x24d   : > { %331 = vrot.lane.b32.xlu0 %v595_v6, %s615_s22 }
 0x2bb   : > { %v321_v42 = vpop.permute.xlu0 %320 }
 0x2bc   : > { %v323_v43 = vadd.f32 %v321_v42, %v227_v31 }
 0x2be   : > { %479 = vtanh.f32 %v323_v43 }
 0x2bf   : > { %v332_v46 = vpop.permute.xlu0 %331 }
 0x2c0   : > { %v334_v49 = vmul.f32 %v478_v39, %v332_v46 }
 0x2cb   : > { %v480_v44 = vpop.eup %479 }
 0x2cc   : > { %327 = vrot.lane.b32.xlu1 %v480_v44, %s616_s23 }
 0x33e   : > { %v328_v48 = vpop.permute.xlu1 %327 }
 0x33f   : > { %v330_v50 = vmul.f32 %v328_v48, %v325_v47 }
 0x341   : > { %v335_v51 = vadd.f32 %v334_v49, %v330_v50 }
 0x343   : > { %v343_v52 = vsel %vm342_vm5, %v335_v51, %v332_v46 }
 0x344   : > { %345 = vrot.lane.b32.xlu1 %v343_v52, %s616_s23 }
 0x3b3   :  { %208 = sbr.rel (!%p205_p7) target bundleno = 264 (0x108), region = 69 }
 0x3b6   : > { %v346_v53 = vpop.permute.xlu1 %345  }
 0x3b7   : > { %v757_v6 = vmov %v346_v53  ;;  %v758_v24 = vmov (%p205_p7), %v346_v53 }
 0x3b8 PF:  { %vm348_vm6 = vcmask 254976   ;;  %s617_s26 = smov [#allocation13]   ;;  %v603_v24 = vphi %v756_v24, %v758_v24  }
 0x3b9   :  { %349 = vst.msk [vmem:[#allocation13] sm:$0x3] %vm348_vm6, %v603_v24  ;;  %s356_s27 = sshll.u32 %s617_s26, 4  ;;  %s357_s27 = int_to_ptr.vmem [resolvable:$true] %s356_s27 }
 0x3ba   :  { %s553_s5 = scalar_lea.vmem %s357_s27, 32  ;;  %p558_p9 = scmp.lt.s32.totalorder %s357_s27, %s357_s27 }
 0x3bb   :  { %p554_p8 = scmp.ne.s32.totalorder %s357_s27, %s553_s5  ;;  %p559_p10 = scmp.lt.s32.totalorder %s553_s5, %s553_s5 }
 0x3bd   :  { %p560_p11 = por %p559_p10, %p558_p9 }
 0x3bf   :  { %p561_p12 = pnand %p560_p11, %p554_p8 }
 0x3c1   :  { %564 = shalt.err (!%p561_p12)
}
 0x3c2   :  { %359 = dma.vmem_to_hbm [thread:$0]  %s357_s27, 32, %s755_s9, [#allocation9]  }
 0x3c3   :  { %591 = dma.done.wait [#allocation9], 32  }
 0x3c4   :  { %592 = vsyncadd [#allocation9], 4294967264 }
 0x3c5   :  { %363 = vsyncpa [#allocation8], 1 }
 0x3c6   :  { %364 = vsyncpa [#allocation11], 1 }
 0x3c7   :  { %365 = vsyncpa [#allocation9], 1 }

</bundles_post_ra>
